<compile_context>
chip_gen: v7x
topology: tpu7x:2x2x1
jax: 0.10.0
libtpu: 0.0.40
codegen_flags: <defaults>
</compile_context>

<pallas_src>
import jax
import jax.numpy as jnp
from jax.experimental import pallas as pl
from jax.experimental.pallas import tpu as pltpu


def _lstm_decoder_kernel(x_ref, h0_ref, c0_ref, wih_ref, whh_ref, b_ref,
                         wfc_ref, bfc_ref,
                         out_ref, hn_ref, cn_ref,
                         gx_scr, hseq_scr):
    T, Bp, H = hseq_scr.shape

    # 1) Non-recurrent input projection for ALL timesteps in one matmul:
    #    [T*Bp, I] @ [I, 4H] + (b_ih + b_hh), stashed in VMEM scratch.
    gx_scr[...] = (jnp.dot(x_ref[...], wih_ref[...],
                           preferred_element_type=jnp.float32)
                   + b_ref[...])

    whh = whh_ref[...]  # [H, 4H], hoisted out of the loop

    # 2) Sequential LSTM recurrence, fully unrolled (T is small and static).
    def step(t, carry):
        h, c = carry
        row = pl.multiple_of(t * Bp, Bp)
        gates = gx_scr[pl.ds(row, Bp), :] + jnp.dot(
            h, whh, preferred_element_type=jnp.float32)        # [Bp, 4H]

        # PyTorch LSTM gate order: i, f, g, o
        i_g = jax.nn.sigmoid(gates[:, 0 * H:1 * H])
        f_g = jax.nn.sigmoid(gates[:, 1 * H:2 * H])
        g_g = jnp.tanh(gates[:, 2 * H:3 * H])
        o_g = jax.nn.sigmoid(gates[:, 3 * H:4 * H])

        c_new = f_g * c + i_g * g_g
        h_new = o_g * jnp.tanh(c_new)
        hseq_scr[t] = h_new
        return (h_new, c_new)

    h_fin, c_fin = jax.lax.fori_loop(
        0, T, step, (h0_ref[...], c0_ref[...]), unroll=True)

    # 3) Final hidden / cell state written exactly once.
    hn_ref[...] = h_fin
    cn_ref[...] = c_fin

    # 4) Output head Linear(tanh(h_t)) for all timesteps at once:
    #    broadcast-multiply + lane reduction -> lane-dense [T, Bp] slab.
    th = jnp.tanh(hseq_scr[...])                               # [T, Bp, H]
    y = jnp.sum(th * wfc_ref[...], axis=-1) + bfc_ref[...]     # [T, Bp]
    out_ref[...] = y.astype(out_ref.dtype)


@jax.jit
def rnn_decoder_forward(cur_input, h0, c0, w_ih, w_hh, b_ih, b_hh, w_fc, b_fc):
    """cur_input: [B, T, I] (batch_first, like PyTorch).
       h0, c0:    [1, B, H] (num_layers=1).
       Returns (output [B, T, 1], (h_n [1, B, H], c_n [1, B, H]))."""
    B, T, I = cur_input.shape
    H = h0.shape[-1]
    Bp = max(8, ((B + 7) // 8) * 8)        # pad batch to full sublanes

    # Layout-only prep in XLA: time-major, pad batch, flatten to [T*Bp, I].
    x_tm = jnp.transpose(cur_input, (1, 0, 2))                 # [T, B, I]
    x_tm = jnp.pad(x_tm, ((0, 0), (0, Bp - B), (0, 0)))        # [T, Bp, I]
    x2d = x_tm.reshape(T * Bp, I)

    h0p = jnp.pad(h0[0], ((0, Bp - B), (0, 0)))                # [Bp, H]
    c0p = jnp.pad(c0[0], ((0, Bp - B), (0, 0)))                # [Bp, H]

    wih_t = w_ih.T                                             # [I, 4H]
    whh_t = w_hh.T                                             # [H, 4H]
    b = (b_ih + b_hh).reshape(1, 4 * H)                        # [1, 4H]
    wfc = w_fc.reshape(1, 1, H)                                # [1, 1, H]
    bfc = b_fc.reshape(1, 1)                                   # [1, 1]

    grid_spec = pltpu.PrefetchScalarGridSpec(
        num_scalar_prefetch=0,
        grid=(1,),                                             # single step
        in_specs=[
            pl.BlockSpec((T * Bp, I), lambda i: (0, 0)),       # x (flat)
            pl.BlockSpec((Bp, H), lambda i: (0, 0)),           # h0
            pl.BlockSpec((Bp, H), lambda i: (0, 0)),           # c0
            pl.BlockSpec((I, 4 * H), lambda i: (0, 0)),        # W_ih^T
            pl.BlockSpec((H, 4 * H), lambda i: (0, 0)),        # W_hh^T
            pl.BlockSpec((1, 4 * H), lambda i: (0, 0)),        # bias
            pl.BlockSpec((1, 1, H), lambda i: (0, 0, 0)),      # W_fc
            pl.BlockSpec((1, 1), lambda i: (0, 0)),            # b_fc
        ],
        out_specs=[
            pl.BlockSpec((T, Bp), lambda i: (0, 0)),           # y [T, Bp]
            pl.BlockSpec((Bp, H), lambda i: (0, 0)),           # h_n
            pl.BlockSpec((Bp, H), lambda i: (0, 0)),           # c_n
        ],
        scratch_shapes=[
            pltpu.VMEM((T * Bp, 4 * H), jnp.float32),          # gates_x
            pltpu.VMEM((T, Bp, H), jnp.float32),               # h sequence
        ],
    )

    y_tb, h_np, c_np = pl.pallas_call(
        _lstm_decoder_kernel,
        out_shape=(
            jax.ShapeDtypeStruct((T, Bp), jnp.float32),
            jax.ShapeDtypeStruct((Bp, H), jnp.float32),
            jax.ShapeDtypeStruct((Bp, H), jnp.float32),
        ),
        grid_spec=grid_spec,
        compiler_params=pltpu.CompilerParams(
            dimension_semantics=("arbitrary",)),
    )(x2d, h0p, c0p, wih_t, whh_t, b, wfc, bfc)

    output = jnp.transpose(y_tb[:, :B])[..., None]             # [B, T, 1]
    h_n = h_np[:B][None]                                       # [1, B, H]
    c_n = c_np[:B][None]                                       # [1, B, H]
    return output, (h_n, c_n)


def _reference_forward(cur_input, h0, c0, w_ih, w_hh, b_ih, b_hh, w_fc, b_fc):
    """Pure-JAX reference (lax.scan LSTM) for correctness checking."""
    x_tm = jnp.transpose(cur_input, (1, 0, 2))
    b = b_ih + b_hh

    def step(carry, x_t):
        h, c = carry
        gates = x_t @ w_ih.T + h @ w_hh.T + b
        i, f, g, o = jnp.split(gates, 4, axis=-1)
        i = jax.nn.sigmoid(i)
        f = jax.nn.sigmoid(f)
        g = jnp.tanh(g)
        o = jax.nn.sigmoid(o)
        c = f * c + i * g
        h = o * jnp.tanh(c)
        return (h, c), h

    (h_n, c_n), hs = jax.lax.scan(step, (h0[0], c0[0]), x_tm)
    out = jnp.tanh(hs) @ w_fc.T + b_fc                          # [T, B, 1]
    return jnp.transpose(out, (1, 0, 2)), (h_n[None], c_n[None])


if __name__ == "__main__":
    # Module config: rnn_model='LSTM', input_size=32, hidden_size=32,
    # num_layers=1, dropout=0.0 (dropout is a no-op for a single layer).
    B, T, I, H = 2, 8, 32, 32

    key = jax.random.PRNGKey(0)
    ks = jax.random.split(key, 9)
    scale = 1.0 / jnp.sqrt(H)

    cur_input = jax.random.normal(ks[0], (B, T, I), jnp.float32)
    h0 = jax.random.normal(ks[1], (1, B, H), jnp.float32)
    c0 = jax.random.normal(ks[2], (1, B, H), jnp.float32)

    # Deterministic synthetic parameters (shapes match nn.LSTM / nn.Linear).
    w_ih = jax.random.uniform(ks[3], (4 * H, I), jnp.float32, -scale, scale)
    w_hh = jax.random.uniform(ks[4], (4 * H, H), jnp.float32, -scale, scale)
    b_ih = jax.random.uniform(ks[5], (4 * H,), jnp.float32, -scale, scale)
    b_hh = jax.random.uniform(ks[6], (4 * H,), jnp.float32, -scale, scale)
    w_fc = jax.random.uniform(ks[7], (1, H), jnp.float32, -scale, scale)
    b_fc = jax.random.uniform(ks[8], (1,), jnp.float32, -scale, scale)

    out, (h_n, c_n) = rnn_decoder_forward(
        cur_input, h0, c0, w_ih, w_hh, b_ih, b_hh, w_fc, b_fc)
    jax.block_until_ready((out, h_n, c_n))

    out_ref, (h_ref, c_ref) = _reference_forward(
        cur_input, h0, c0, w_ih, w_hh, b_ih, b_hh, w_fc, b_fc)

    assert out.shape == (B, T, 1)
    assert h_n.shape == (1, B, H) and c_n.shape == (1, B, H)
    assert jnp.allclose(out, out_ref, atol=1e-5, rtol=1e-5)
    assert jnp.allclose(h_n, h_ref, atol=1e-5, rtol=1e-5)
    assert jnp.allclose(c_n, c_ref, atol=1e-5, rtol=1e-5)

    print("KERNEL_OK")
</pallas_src>

<mosaic_0001>
module attributes {stable_mosaic.version = 11 : i64} {
  func.func @_lstm_decoder_kernel(%arg0: i32, %arg1: memref<64x32xf32, #tpu.memory_space<vmem>>, %arg2: memref<8x32xf32, #tpu.memory_space<vmem>>, %arg3: memref<8x32xf32, #tpu.memory_space<vmem>>, %arg4: memref<32x128xf32, #tpu.memory_space<vmem>>, %arg5: memref<32x128xf32, #tpu.memory_space<vmem>>, %arg6: memref<1x128xf32, #tpu.memory_space<vmem>>, %arg7: memref<1x1x32xf32, #tpu.memory_space<vmem>>, %arg8: memref<1x1xf32, #tpu.memory_space<vmem>>, %arg9: memref<8x8xf32, #tpu.memory_space<vmem>>, %arg10: memref<8x32xf32, #tpu.memory_space<vmem>>, %arg11: memref<8x32xf32, #tpu.memory_space<vmem>>, %arg12: memref<64x128xf32, #tpu.memory_space<vmem>>, %arg13: memref<8x8x32xf32, #tpu.memory_space<vmem>>) attributes {dimension_semantics = [#tpu.dimension_semantics<arbitrary>], iteration_bounds = array<i64: 1>, scalar_prefetch = 0 : i64, scratch_operands = 2 : i64, tpu.core_type = #tpu.core_type<tc>, window_params = [{pipeline_mode = #tpu.pipeline_mode<synchronous>, transform_indices = @transform_0, window_bounds = array<i64: 64, 32>}, {pipeline_mode = #tpu.pipeline_mode<synchronous>, transform_indices = @transform_1, window_bounds = array<i64: 8, 32>}, {pipeline_mode = #tpu.pipeline_mode<synchronous>, transform_indices = @transform_2, window_bounds = array<i64: 8, 32>}, {pipeline_mode = #tpu.pipeline_mode<synchronous>, transform_indices = @transform_3, window_bounds = array<i64: 32, 128>}, {pipeline_mode = #tpu.pipeline_mode<synchronous>, transform_indices = @transform_4, window_bounds = array<i64: 32, 128>}, {pipeline_mode = #tpu.pipeline_mode<synchronous>, transform_indices = @transform_5, window_bounds = array<i64: 1, 128>}, {pipeline_mode = #tpu.pipeline_mode<synchronous>, transform_indices = @transform_6, window_bounds = array<i64: 1, 1, 32>}, {pipeline_mode = #tpu.pipeline_mode<synchronous>, transform_indices = @transform_7, window_bounds = array<i64: 1, 1>}, {pipeline_mode = #tpu.pipeline_mode<synchronous>, transform_indices = @transform_8, window_bounds = array<i64: 8, 8>}, {pipeline_mode = #tpu.pipeline_mode<synchronous>, transform_indices = @transform_9, window_bounds = array<i64: 8, 32>}, {pipeline_mode = #tpu.pipeline_mode<synchronous>, transform_indices = @transform_10, window_bounds = array<i64: 8, 32>}]} {
    %c0 = arith.constant 0 : index
    %c0_0 = arith.constant 0 : index
    %0 = vector.load %arg1[%c0, %c0_0] : memref<64x32xf32, #tpu.memory_space<vmem>>, vector<64x32xf32>
    %c0_1 = arith.constant 0 : index
    %c0_2 = arith.constant 0 : index
    %1 = vector.load %arg4[%c0_1, %c0_2] : memref<32x128xf32, #tpu.memory_space<vmem>>, vector<32x128xf32>
    %cst = arith.constant dense<0.000000e+00> : vector<64x128xf32>
    %2 = tpu.matmul %0, %1, %cst {dimension_numbers = #tpu.dot_dimension_numbers<[1], [0], [0], [1], [0, 0, 1, 1], [], []>} : vector<64x32xf32>, vector<32x128xf32>, vector<64x128xf32> -> vector<64x128xf32>
    %c0_3 = arith.constant 0 : index
    %c0_4 = arith.constant 0 : index
    %3 = vector.load %arg6[%c0_3, %c0_4] : memref<1x128xf32, #tpu.memory_space<vmem>>, vector<1x128xf32>
    %4 = vector.broadcast %3 : vector<1x128xf32> to vector<64x128xf32>
    %5 = arith.addf %2, %4 : vector<64x128xf32>
    %c0_5 = arith.constant 0 : index
    %c0_6 = arith.constant 0 : index
    %6 = vector.load %arg12[%c0_5, %c0_6] : memref<64x128xf32, #tpu.memory_space<vmem>>, vector<64x128xf32>
    tpu.vector_store %arg12[%c0_5, %c0_6], %5 {strides = array<i32>} : memref<64x128xf32, #tpu.memory_space<vmem>>, vector<64x128xf32>,
    %c0_7 = arith.constant 0 : index
    %c0_8 = arith.constant 0 : index
    %7 = vector.load %arg5[%c0_7, %c0_8] : memref<32x128xf32, #tpu.memory_space<vmem>>, vector<32x128xf32>
    %c0_9 = arith.constant 0 : index
    %c0_10 = arith.constant 0 : index
    %8 = vector.load %arg2[%c0_9, %c0_10] : memref<8x32xf32, #tpu.memory_space<vmem>>, vector<8x32xf32>
    %c0_11 = arith.constant 0 : index
    %c0_12 = arith.constant 0 : index
    %9 = vector.load %arg3[%c0_11, %c0_12] : memref<8x32xf32, #tpu.memory_space<vmem>>, vector<8x32xf32>
    %c0_i32 = arith.constant 0 : i32
    %c8_i32 = arith.constant 8 : i32
    %10 = arith.muli %c0_i32, %c8_i32 : i32
    %11 = tpu.assume_multiple %10, 8 : i32
    %12 = arith.index_cast %11 : i32 to index
    %c0_13 = arith.constant 0 : index
    %13 = vector.load %arg12[%12, %c0_13] : memref<64x128xf32, #tpu.memory_space<vmem>>, vector<8x128xf32>
    %cst_14 = arith.constant dense<0.000000e+00> : vector<8x128xf32>
    %14 = tpu.matmul %8, %7, %cst_14 {dimension_numbers = #tpu.dot_dimension_numbers<[1], [0], [0], [1], [0, 0, 1, 1], [], []>} : vector<8x32xf32>, vector<32x128xf32>, vector<8x128xf32> -> vector<8x128xf32>
    %15 = arith.addf %13, %14 : vector<8x128xf32>
    %16 = vector.extract_strided_slice %15 {offsets = [0, 0], sizes = [8, 32], strides = [1, 1]} : vector<8x128xf32> to vector<8x32xf32>
    %17 = arith.negf %16 : vector<8x32xf32>
    %18 = math.exp %17 : vector<8x32xf32>
    %cst_15 = arith.constant 1.000000e+00 : f32
    %19 = vector.broadcast %cst_15 : f32 to vector<8x32xf32>
    %20 = arith.addf %19, %18 : vector<8x32xf32>
    %21 = arith.divf %19, %20 : vector<8x32xf32>
    %22 = vector.extract_strided_slice %15 {offsets = [0, 32], sizes = [8, 32], strides = [1, 1]} : vector<8x128xf32> to vector<8x32xf32>
    %23 = arith.negf %22 : vector<8x32xf32>
    %24 = math.exp %23 : vector<8x32xf32>
    %cst_16 = arith.constant 1.000000e+00 : f32
    %25 = vector.broadcast %cst_16 : f32 to vector<8x32xf32>
    %26 = arith.addf %25, %24 : vector<8x32xf32>
    %27 = arith.divf %25, %26 : vector<8x32xf32>
    %28 = vector.extract_strided_slice %15 {offsets = [0, 64], sizes = [8, 32], strides = [1, 1]} : vector<8x128xf32> to vector<8x32xf32>
    %29 = math.tanh %28 : vector<8x32xf32>
    %30 = vector.extract_strided_slice %15 {offsets = [0, 96], sizes = [8, 32], strides = [1, 1]} : vector<8x128xf32> to vector<8x32xf32>
    %31 = arith.negf %30 : vector<8x32xf32>
    %32 = math.exp %31 : vector<8x32xf32>
    %cst_17 = arith.constant 1.000000e+00 : f32
    %33 = vector.broadcast %cst_17 : f32 to vector<8x32xf32>
    %34 = arith.addf %33, %32 : vector<8x32xf32>
    %35 = arith.divf %33, %34 : vector<8x32xf32>
    %36 = arith.mulf %27, %9 : vector<8x32xf32>
    %37 = arith.mulf %21, %29 : vector<8x32xf32>
    %38 = arith.addf %36, %37 : vector<8x32xf32>
    %39 = math.tanh %38 : vector<8x32xf32>
    %40 = arith.mulf %35, %39 : vector<8x32xf32>
    %41 = arith.index_cast %c0_i32 : i32 to index
    %c0_18 = arith.constant 0 : index
    %c0_19 = arith.constant 0 : index
    %42 = vector.load %arg13[%41, %c0_18, %c0_19] : memref<8x8x32xf32, #tpu.memory_space<vmem>>, vector<1x8x32xf32>
    %43 = vector.shape_cast %42 : vector<1x8x32xf32> to vector<8x32xf32>
    %44 = vector.shape_cast %40 : vector<8x32xf32> to vector<1x8x32xf32>
    tpu.vector_store %arg13[%41, %c0_18, %c0_19], %44 {strides = array<i32>} : memref<8x8x32xf32, #tpu.memory_space<vmem>>, vector<1x8x32xf32>,
    %c1_i32 = arith.constant 1 : i32
    %c8_i32_20 = arith.constant 8 : i32
    %45 = arith.muli %c1_i32, %c8_i32_20 : i32
    %46 = tpu.assume_multiple %45, 8 : i32
    %47 = arith.index_cast %46 : i32 to index
    %c0_21 = arith.constant 0 : index
    %48 = vector.load %arg12[%47, %c0_21] : memref<64x128xf32, #tpu.memory_space<vmem>>, vector<8x128xf32>
    %cst_22 = arith.constant dense<0.000000e+00> : vector<8x128xf32>
    %49 = tpu.matmul %40, %7, %cst_22 {dimension_numbers = #tpu.dot_dimension_numbers<[1], [0], [0], [1], [0, 0, 1, 1], [], []>} : vector<8x32xf32>, vector<32x128xf32>, vector<8x128xf32> -> vector<8x128xf32>
    %50 = arith.addf %48, %49 : vector<8x128xf32>
    %51 = vector.extract_strided_slice %50 {offsets = [0, 0], sizes = [8, 32], strides = [1, 1]} : vector<8x128xf32> to vector<8x32xf32>
    %52 = arith.negf %51 : vector<8x32xf32>
    %53 = math.exp %52 : vector<8x32xf32>
    %cst_23 = arith.constant 1.000000e+00 : f32
    %54 = vector.broadcast %cst_23 : f32 to vector<8x32xf32>
    %55 = arith.addf %54, %53 : vector<8x32xf32>
    %56 = arith.divf %54, %55 : vector<8x32xf32>
    %57 = vector.extract_strided_slice %50 {offsets = [0, 32], sizes = [8, 32], strides = [1, 1]} : vector<8x128xf32> to vector<8x32xf32>
    %58 = arith.negf %57 : vector<8x32xf32>
    %59 = math.exp %58 : vector<8x32xf32>
    %cst_24 = arith.constant 1.000000e+00 : f32
    %60 = vector.broadcast %cst_24 : f32 to vector<8x32xf32>
    %61 = arith.addf %60, %59 : vector<8x32xf32>
    %62 = arith.divf %60, %61 : vector<8x32xf32>
    %63 = vector.extract_strided_slice %50 {offsets = [0, 64], sizes = [8, 32], strides = [1, 1]} : vector<8x128xf32> to vector<8x32xf32>
    %64 = math.tanh %63 : vector<8x32xf32>
    %65 = vector.extract_strided_slice %50 {offsets = [0, 96], sizes = [8, 32], strides = [1, 1]} : vector<8x128xf32> to vector<8x32xf32>
    %66 = arith.negf %65 : vector<8x32xf32>
    %67 = math.exp %66 : vector<8x32xf32>
    %cst_25 = arith.constant 1.000000e+00 : f32
    %68 = vector.broadcast %cst_25 : f32 to vector<8x32xf32>
    %69 = arith.addf %68, %67 : vector<8x32xf32>
    %70 = arith.divf %68, %69 : vector<8x32xf32>
    %71 = arith.mulf %62, %38 : vector<8x32xf32>
    %72 = arith.mulf %56, %64 : vector<8x32xf32>
    %73 = arith.addf %71, %72 : vector<8x32xf32>
    %74 = math.tanh %73 : vector<8x32xf32>
    %75 = arith.mulf %70, %74 : vector<8x32xf32>
    %76 = arith.index_cast %c1_i32 : i32 to index
    %c0_26 = arith.constant 0 : index
    %c0_27 = arith.constant 0 : index
    %77 = vector.load %arg13[%76, %c0_26, %c0_27] : memref<8x8x32xf32, #tpu.memory_space<vmem>>, vector<1x8x32xf32>
    %78 = vector.shape_cast %77 : vector<1x8x32xf32> to vector<8x32xf32>
    %79 = vector.shape_cast %75 : vector<8x32xf32> to vector<1x8x32xf32>
    tpu.vector_store %arg13[%76, %c0_26, %c0_27], %79 {strides = array<i32>} : memref<8x8x32xf32, #tpu.memory_space<vmem>>, vector<1x8x32xf32>,
    %c2_i32 = arith.constant 2 : i32
    %c8_i32_28 = arith.constant 8 : i32
    %80 = arith.muli %c2_i32, %c8_i32_28 : i32
    %81 = tpu.assume_multiple %80, 8 : i32
    %82 = arith.index_cast %81 : i32 to index
    %c0_29 = arith.constant 0 : index
    %83 = vector.load %arg12[%82, %c0_29] : memref<64x128xf32, #tpu.memory_space<vmem>>, vector<8x128xf32>
    %cst_30 = arith.constant dense<0.000000e+00> : vector<8x128xf32>
    %84 = tpu.matmul %75, %7, %cst_30 {dimension_numbers = #tpu.dot_dimension_numbers<[1], [0], [0], [1], [0, 0, 1, 1], [], []>} : vector<8x32xf32>, vector<32x128xf32>, vector<8x128xf32> -> vector<8x128xf32>
    %85 = arith.addf %83, %84 : vector<8x128xf32>
    %86 = vector.extract_strided_slice %85 {offsets = [0, 0], sizes = [8, 32], strides = [1, 1]} : vector<8x128xf32> to vector<8x32xf32>
    %87 = arith.negf %86 : vector<8x32xf32>
    %88 = math.exp %87 : vector<8x32xf32>
    %cst_31 = arith.constant 1.000000e+00 : f32
    %89 = vector.broadcast %cst_31 : f32 to vector<8x32xf32>
    %90 = arith.addf %89, %88 : vector<8x32xf32>
    %91 = arith.divf %89, %90 : vector<8x32xf32>
    %92 = vector.extract_strided_slice %85 {offsets = [0, 32], sizes = [8, 32], strides = [1, 1]} : vector<8x128xf32> to vector<8x32xf32>
    %93 = arith.negf %92 : vector<8x32xf32>
    %94 = math.exp %93 : vector<8x32xf32>
    %cst_32 = arith.constant 1.000000e+00 : f32
    %95 = vector.broadcast %cst_32 : f32 to vector<8x32xf32>
    %96 = arith.addf %95, %94 : vector<8x32xf32>
    %97 = arith.divf %95, %96 : vector<8x32xf32>
    %98 = vector.extract_strided_slice %85 {offsets = [0, 64], sizes = [8, 32], strides = [1, 1]} : vector<8x128xf32> to vector<8x32xf32>
    %99 = math.tanh %98 : vector<8x32xf32>
    %100 = vector.extract_strided_slice %85 {offsets = [0, 96], sizes = [8, 32], strides = [1, 1]} : vector<8x128xf32> to vector<8x32xf32>
    %101 = arith.negf %100 : vector<8x32xf32>
    %102 = math.exp %101 : vector<8x32xf32>
    %cst_33 = arith.constant 1.000000e+00 : f32
    %103 = vector.broadcast %cst_33 : f32 to vector<8x32xf32>
    %104 = arith.addf %103, %102 : vector<8x32xf32>
    %105 = arith.divf %103, %104 : vector<8x32xf32>
    %106 = arith.mulf %97, %73 : vector<8x32xf32>
    %107 = arith.mulf %91, %99 : vector<8x32xf32>
    %108 = arith.addf %106, %107 : vector<8x32xf32>
    %109 = math.tanh %108 : vector<8x32xf32>
    %110 = arith.mulf %105, %109 : vector<8x32xf32>
    %111 = arith.index_cast %c2_i32 : i32 to index
    %c0_34 = arith.constant 0 : index
    %c0_35 = arith.constant 0 : index
    %112 = vector.load %arg13[%111, %c0_34, %c0_35] : memref<8x8x32xf32, #tpu.memory_space<vmem>>, vector<1x8x32xf32>
    %113 = vector.shape_cast %112 : vector<1x8x32xf32> to vector<8x32xf32>
    %114 = vector.shape_cast %110 : vector<8x32xf32> to vector<1x8x32xf32>
    tpu.vector_store %arg13[%111, %c0_34, %c0_35], %114 {strides = array<i32>} : memref<8x8x32xf32, #tpu.memory_space<vmem>>, vector<1x8x32xf32>,
    %c3_i32 = arith.constant 3 : i32
    %c8_i32_36 = arith.constant 8 : i32
    %115 = arith.muli %c3_i32, %c8_i32_36 : i32
    %116 = tpu.assume_multiple %115, 8 : i32
    %117 = arith.index_cast %116 : i32 to index
    %c0_37 = arith.constant 0 : index
    %118 = vector.load %arg12[%117, %c0_37] : memref<64x128xf32, #tpu.memory_space<vmem>>, vector<8x128xf32>
    %cst_38 = arith.constant dense<0.000000e+00> : vector<8x128xf32>
    %119 = tpu.matmul %110, %7, %cst_38 {dimension_numbers = #tpu.dot_dimension_numbers<[1], [0], [0], [1], [0, 0, 1, 1], [], []>} : vector<8x32xf32>, vector<32x128xf32>, vector<8x128xf32> -> vector<8x128xf32>
    %120 = arith.addf %118, %119 : vector<8x128xf32>
    %121 = vector.extract_strided_slice %120 {offsets = [0, 0], sizes = [8, 32], strides = [1, 1]} : vector<8x128xf32> to vector<8x32xf32>
    %122 = arith.negf %121 : vector<8x32xf32>
    %123 = math.exp %122 : vector<8x32xf32>
    %cst_39 = arith.constant 1.000000e+00 : f32
    %124 = vector.broadcast %cst_39 : f32 to vector<8x32xf32>
    %125 = arith.addf %124, %123 : vector<8x32xf32>
    %126 = arith.divf %124, %125 : vector<8x32xf32>
    %127 = vector.extract_strided_slice %120 {offsets = [0, 32], sizes = [8, 32], strides = [1, 1]} : vector<8x128xf32> to vector<8x32xf32>
    %128 = arith.negf %127 : vector<8x32xf32>
    %129 = math.exp %128 : vector<8x32xf32>
    %cst_40 = arith.constant 1.000000e+00 : f32
    %130 = vector.broadcast %cst_40 : f32 to vector<8x32xf32>
    %131 = arith.addf %130, %129 : vector<8x32xf32>
    %132 = arith.divf %130, %131 : vector<8x32xf32>
    %133 = vector.extract_strided_slice %120 {offsets = [0, 64], sizes = [8, 32], strides = [1, 1]} : vector<8x128xf32> to vector<8x32xf32>
    %134 = math.tanh %133 : vector<8x32xf32>
    %135 = vector.extract_strided_slice %120 {offsets = [0, 96], sizes = [8, 32], strides = [1, 1]} : vector<8x128xf32> to vector<8x32xf32>
    %136 = arith.negf %135 : vector<8x32xf32>
    %137 = math.exp %136 : vector<8x32xf32>
    %cst_41 = arith.constant 1.000000e+00 : f32
    %138 = vector.broadcast %cst_41 : f32 to vector<8x32xf32>
    %139 = arith.addf %138, %137 : vector<8x32xf32>
    %140 = arith.divf %138, %139 : vector<8x32xf32>
    %141 = arith.mulf %132, %108 : vector<8x32xf32>
    %142 = arith.mulf %126, %134 : vector<8x32xf32>
    %143 = arith.addf %141, %142 : vector<8x32xf32>
    %144 = math.tanh %143 : vector<8x32xf32>
    %145 = arith.mulf %140, %144 : vector<8x32xf32>
    %146 = arith.index_cast %c3_i32 : i32 to index
    %c0_42 = arith.constant 0 : index
    %c0_43 = arith.constant 0 : index
    %147 = vector.load %arg13[%146, %c0_42, %c0_43] : memref<8x8x32xf32, #tpu.memory_space<vmem>>, vector<1x8x32xf32>
    %148 = vector.shape_cast %147 : vector<1x8x32xf32> to vector<8x32xf32>
    %149 = vector.shape_cast %145 : vector<8x32xf32> to vector<1x8x32xf32>
    tpu.vector_store %arg13[%146, %c0_42, %c0_43], %149 {strides = array<i32>} : memref<8x8x32xf32, #tpu.memory_space<vmem>>, vector<1x8x32xf32>,
    %c4_i32 = arith.constant 4 : i32
    %c8_i32_44 = arith.constant 8 : i32
    %150 = arith.muli %c4_i32, %c8_i32_44 : i32
    %151 = tpu.assume_multiple %150, 8 : i32
    %152 = arith.index_cast %151 : i32 to index
    %c0_45 = arith.constant 0 : index
    %153 = vector.load %arg12[%152, %c0_45] : memref<64x128xf32, #tpu.memory_space<vmem>>, vector<8x128xf32>
    %cst_46 = arith.constant dense<0.000000e+00> : vector<8x128xf32>
    %154 = tpu.matmul %145, %7, %cst_46 {dimension_numbers = #tpu.dot_dimension_numbers<[1], [0], [0], [1], [0, 0, 1, 1], [], []>} : vector<8x32xf32>, vector<32x128xf32>, vector<8x128xf32> -> vector<8x128xf32>
    %155 = arith.addf %153, %154 : vector<8x128xf32>
    %156 = vector.extract_strided_slice %155 {offsets = [0, 0], sizes = [8, 32], strides = [1, 1]} : vector<8x128xf32> to vector<8x32xf32>
    %157 = arith.negf %156 : vector<8x32xf32>
    %158 = math.exp %157 : vector<8x32xf32>
    %cst_47 = arith.constant 1.000000e+00 : f32
    %159 = vector.broadcast %cst_47 : f32 to vector<8x32xf32>
    %160 = arith.addf %159, %158 : vector<8x32xf32>
    %161 = arith.divf %159, %160 : vector<8x32xf32>
    %162 = vector.extract_strided_slice %155 {offsets = [0, 32], sizes = [8, 32], strides = [1, 1]} : vector<8x128xf32> to vector<8x32xf32>
    %163 = arith.negf %162 : vector<8x32xf32>
    %164 = math.exp %163 : vector<8x32xf32>
    %cst_48 = arith.constant 1.000000e+00 : f32
    %165 = vector.broadcast %cst_48 : f32 to vector<8x32xf32>
    %166 = arith.addf %165, %164 : vector<8x32xf32>
    %167 = arith.divf %165, %166 : vector<8x32xf32>
    %168 = vector.extract_strided_slice %155 {offsets = [0, 64], sizes = [8, 32], strides = [1, 1]} : vector<8x128xf32> to vector<8x32xf32>
    %169 = math.tanh %168 : vector<8x32xf32>
    %170 = vector.extract_strided_slice %155 {offsets = [0, 96], sizes = [8, 32], strides = [1, 1]} : vector<8x128xf32> to vector<8x32xf32>
    %171 = arith.negf %170 : vector<8x32xf32>
    %172 = math.exp %171 : vector<8x32xf32>
    %cst_49 = arith.constant 1.000000e+00 : f32
    %173 = vector.broadcast %cst_49 : f32 to vector<8x32xf32>
    %174 = arith.addf %173, %172 : vector<8x32xf32>
    %175 = arith.divf %173, %174 : vector<8x32xf32>
    %176 = arith.mulf %167, %143 : vector<8x32xf32>
    %177 = arith.mulf %161, %169 : vector<8x32xf32>
    %178 = arith.addf %176, %177 : vector<8x32xf32>
    %179 = math.tanh %178 : vector<8x32xf32>
    %180 = arith.mulf %175, %179 : vector<8x32xf32>
    %181 = arith.index_cast %c4_i32 : i32 to index
    %c0_50 = arith.constant 0 : index
    %c0_51 = arith.constant 0 : index
    %182 = vector.load %arg13[%181, %c0_50, %c0_51] : memref<8x8x32xf32, #tpu.memory_space<vmem>>, vector<1x8x32xf32>
    %183 = vector.shape_cast %182 : vector<1x8x32xf32> to vector<8x32xf32>
    %184 = vector.shape_cast %180 : vector<8x32xf32> to vector<1x8x32xf32>
    tpu.vector_store %arg13[%181, %c0_50, %c0_51], %184 {strides = array<i32>} : memref<8x8x32xf32, #tpu.memory_space<vmem>>, vector<1x8x32xf32>,
    %c5_i32 = arith.constant 5 : i32
    %c8_i32_52 = arith.constant 8 : i32
    %185 = arith.muli %c5_i32, %c8_i32_52 : i32
    %186 = tpu.assume_multiple %185, 8 : i32
    %187 = arith.index_cast %186 : i32 to index
    %c0_53 = arith.constant 0 : index
    %188 = vector.load %arg12[%187, %c0_53] : memref<64x128xf32, #tpu.memory_space<vmem>>, vector<8x128xf32>
    %cst_54 = arith.constant dense<0.000000e+00> : vector<8x128xf32>
    %189 = tpu.matmul %180, %7, %cst_54 {dimension_numbers = #tpu.dot_dimension_numbers<[1], [0], [0], [1], [0, 0, 1, 1], [], []>} : vector<8x32xf32>, vector<32x128xf32>, vector<8x128xf32> -> vector<8x128xf32>
    %190 = arith.addf %188, %189 : vector<8x128xf32>
    %191 = vector.extract_strided_slice %190 {offsets = [0, 0], sizes = [8, 32], strides = [1, 1]} : vector<8x128xf32> to vector<8x32xf32>
    %192 = arith.negf %191 : vector<8x32xf32>
    %193 = math.exp %192 : vector<8x32xf32>
    %cst_55 = arith.constant 1.000000e+00 : f32
    %194 = vector.broadcast %cst_55 : f32 to vector<8x32xf32>
    %195 = arith.addf %194, %193 : vector<8x32xf32>
    %196 = arith.divf %194, %195 : vector<8x32xf32>
    %197 = vector.extract_strided_slice %190 {offsets = [0, 32], sizes = [8, 32], strides = [1, 1]} : vector<8x128xf32> to vector<8x32xf32>
    %198 = arith.negf %197 : vector<8x32xf32>
    %199 = math.exp %198 : vector<8x32xf32>
    %cst_56 = arith.constant 1.000000e+00 : f32
    %200 = vector.broadcast %cst_56 : f32 to vector<8x32xf32>
    %201 = arith.addf %200, %199 : vector<8x32xf32>
    %202 = arith.divf %200, %201 : vector<8x32xf32>
    %203 = vector.extract_strided_slice %190 {offsets = [0, 64], sizes = [8, 32], strides = [1, 1]} : vector<8x128xf32> to vector<8x32xf32>
    %204 = math.tanh %203 : vector<8x32xf32>
    %205 = vector.extract_strided_slice %190 {offsets = [0, 96], sizes = [8, 32], strides = [1, 1]} : vector<8x128xf32> to vector<8x32xf32>
    %206 = arith.negf %205 : vector<8x32xf32>
    %207 = math.exp %206 : vector<8x32xf32>
    %cst_57 = arith.constant 1.000000e+00 : f32
    %208 = vector.broadcast %cst_57 : f32 to vector<8x32xf32>
    %209 = arith.addf %208, %207 : vector<8x32xf32>
    %210 = arith.divf %208, %209 : vector<8x32xf32>
    %211 = arith.mulf %202, %178 : vector<8x32xf32>
    %212 = arith.mulf %196, %204 : vector<8x32xf32>
    %213 = arith.addf %211, %212 : vector<8x32xf32>
    %214 = math.tanh %213 : vector<8x32xf32>
    %215 = arith.mulf %210, %214 : vector<8x32xf32>
    %216 = arith.index_cast %c5_i32 : i32 to index
    %c0_58 = arith.constant 0 : index
    %c0_59 = arith.constant 0 : index
    %217 = vector.load %arg13[%216, %c0_58, %c0_59] : memref<8x8x32xf32, #tpu.memory_space<vmem>>, vector<1x8x32xf32>
    %218 = vector.shape_cast %217 : vector<1x8x32xf32> to vector<8x32xf32>
    %219 = vector.shape_cast %215 : vector<8x32xf32> to vector<1x8x32xf32>
    tpu.vector_store %arg13[%216, %c0_58, %c0_59], %219 {strides = array<i32>} : memref<8x8x32xf32, #tpu.memory_space<vmem>>, vector<1x8x32xf32>,
    %c6_i32 = arith.constant 6 : i32
    %c8_i32_60 = arith.constant 8 : i32
    %220 = arith.muli %c6_i32, %c8_i32_60 : i32
    %221 = tpu.assume_multiple %220, 8 : i32
    %222 = arith.index_cast %221 : i32 to index
    %c0_61 = arith.constant 0 : index
    %223 = vector.load %arg12[%222, %c0_61] : memref<64x128xf32, #tpu.memory_space<vmem>>, vector<8x128xf32>
    %cst_62 = arith.constant dense<0.000000e+00> : vector<8x128xf32>
    %224 = tpu.matmul %215, %7, %cst_62 {dimension_numbers = #tpu.dot_dimension_numbers<[1], [0], [0], [1], [0, 0, 1, 1], [], []>} : vector<8x32xf32>, vector<32x128xf32>, vector<8x128xf32> -> vector<8x128xf32>
    %225 = arith.addf %223, %224 : vector<8x128xf32>
    %226 = vector.extract_strided_slice %225 {offsets = [0, 0], sizes = [8, 32], strides = [1, 1]} : vector<8x128xf32> to vector<8x32xf32>
    %227 = arith.negf %226 : vector<8x32xf32>
    %228 = math.exp %227 : vector<8x32xf32>
    %cst_63 = arith.constant 1.000000e+00 : f32
    %229 = vector.broadcast %cst_63 : f32 to vector<8x32xf32>
    %230 = arith.addf %229, %228 : vector<8x32xf32>
    %231 = arith.divf %229, %230 : vector<8x32xf32>
    %232 = vector.extract_strided_slice %225 {offsets = [0, 32], sizes = [8, 32], strides = [1, 1]} : vector<8x128xf32> to vector<8x32xf32>
    %233 = arith.negf %232 : vector<8x32xf32>
    %234 = math.exp %233 : vector<8x32xf32>
    %cst_64 = arith.constant 1.000000e+00 : f32
    %235 = vector.broadcast %cst_64 : f32 to vector<8x32xf32>
    %236 = arith.addf %235, %234 : vector<8x32xf32>
    %237 = arith.divf %235, %236 : vector<8x32xf32>
    %238 = vector.extract_strided_slice %225 {offsets = [0, 64], sizes = [8, 32], strides = [1, 1]} : vector<8x128xf32> to vector<8x32xf32>
    %239 = math.tanh %238 : vector<8x32xf32>
    %240 = vector.extract_strided_slice %225 {offsets = [0, 96], sizes = [8, 32], strides = [1, 1]} : vector<8x128xf32> to vector<8x32xf32>
    %241 = arith.negf %240 : vector<8x32xf32>
    %242 = math.exp %241 : vector<8x32xf32>
    %cst_65 = arith.constant 1.000000e+00 : f32
    %243 = vector.broadcast %cst_65 : f32 to vector<8x32xf32>
    %244 = arith.addf %243, %242 : vector<8x32xf32>
    %245 = arith.divf %243, %244 : vector<8x32xf32>
    %246 = arith.mulf %237, %213 : vector<8x32xf32>
    %247 = arith.mulf %231, %239 : vector<8x32xf32>
    %248 = arith.addf %246, %247 : vector<8x32xf32>
    %249 = math.tanh %248 : vector<8x32xf32>
    %250 = arith.mulf %245, %249 : vector<8x32xf32>
    %251 = arith.index_cast %c6_i32 : i32 to index
    %c0_66 = arith.constant 0 : index
    %c0_67 = arith.constant 0 : index
    %252 = vector.load %arg13[%251, %c0_66, %c0_67] : memref<8x8x32xf32, #tpu.memory_space<vmem>>, vector<1x8x32xf32>
    %253 = vector.shape_cast %252 : vector<1x8x32xf32> to vector<8x32xf32>
    %254 = vector.shape_cast %250 : vector<8x32xf32> to vector<1x8x32xf32>
    tpu.vector_store %arg13[%251, %c0_66, %c0_67], %254 {strides = array<i32>} : memref<8x8x32xf32, #tpu.memory_space<vmem>>, vector<1x8x32xf32>,
    %c7_i32 = arith.constant 7 : i32
    %c8_i32_68 = arith.constant 8 : i32
    %255 = arith.muli %c7_i32, %c8_i32_68 : i32
    %256 = tpu.assume_multiple %255, 8 : i32
    %257 = arith.index_cast %256 : i32 to index
    %c0_69 = arith.constant 0 : index
    %258 = vector.load %arg12[%257, %c0_69] : memref<64x128xf32, #tpu.memory_space<vmem>>, vector<8x128xf32>
    %cst_70 = arith.constant dense<0.000000e+00> : vector<8x128xf32>
    %259 = tpu.matmul %250, %7, %cst_70 {dimension_numbers = #tpu.dot_dimension_numbers<[1], [0], [0], [1], [0, 0, 1, 1], [], []>} : vector<8x32xf32>, vector<32x128xf32>, vector<8x128xf32> -> vector<8x128xf32>
    %260 = arith.addf %258, %259 : vector<8x128xf32>
    %261 = vector.extract_strided_slice %260 {offsets = [0, 0], sizes = [8, 32], strides = [1, 1]} : vector<8x128xf32> to vector<8x32xf32>
    %262 = arith.negf %261 : vector<8x32xf32>
    %263 = math.exp %262 : vector<8x32xf32>
    %cst_71 = arith.constant 1.000000e+00 : f32
    %264 = vector.broadcast %cst_71 : f32 to vector<8x32xf32>
    %265 = arith.addf %264, %263 : vector<8x32xf32>
    %266 = arith.divf %264, %265 : vector<8x32xf32>
    %267 = vector.extract_strided_slice %260 {offsets = [0, 32], sizes = [8, 32], strides = [1, 1]} : vector<8x128xf32> to vector<8x32xf32>
    %268 = arith.negf %267 : vector<8x32xf32>
    %269 = math.exp %268 : vector<8x32xf32>
    %cst_72 = arith.constant 1.000000e+00 : f32
    %270 = vector.broadcast %cst_72 : f32 to vector<8x32xf32>
    %271 = arith.addf %270, %269 : vector<8x32xf32>
    %272 = arith.divf %270, %271 : vector<8x32xf32>
    %273 = vector.extract_strided_slice %260 {offsets = [0, 64], sizes = [8, 32], strides = [1, 1]} : vector<8x128xf32> to vector<8x32xf32>
    %274 = math.tanh %273 : vector<8x32xf32>
    %275 = vector.extract_strided_slice %260 {offsets = [0, 96], sizes = [8, 32], strides = [1, 1]} : vector<8x128xf32> to vector<8x32xf32>
    %276 = arith.negf %275 : vector<8x32xf32>
    %277 = math.exp %276 : vector<8x32xf32>
    %cst_73 = arith.constant 1.000000e+00 : f32
    %278 = vector.broadcast %cst_73 : f32 to vector<8x32xf32>
    %279 = arith.addf %278, %277 : vector<8x32xf32>
    %280 = arith.divf %278, %279 : vector<8x32xf32>
    %281 = arith.mulf %272, %248 : vector<8x32xf32>
    %282 = arith.mulf %266, %274 : vector<8x32xf32>
    %283 = arith.addf %281, %282 : vector<8x32xf32>
    %284 = math.tanh %283 : vector<8x32xf32>
    %285 = arith.mulf %280, %284 : vector<8x32xf32>
    %286 = arith.index_cast %c7_i32 : i32 to index
    %c0_74 = arith.constant 0 : index
    %c0_75 = arith.constant 0 : index
    %287 = vector.load %arg13[%286, %c0_74, %c0_75] : memref<8x8x32xf32, #tpu.memory_space<vmem>>, vector<1x8x32xf32>
    %288 = vector.shape_cast %287 : vector<1x8x32xf32> to vector<8x32xf32>
    %289 = vector.shape_cast %285 : vector<8x32xf32> to vector<1x8x32xf32>
    tpu.vector_store %arg13[%286, %c0_74, %c0_75], %289 {strides = array<i32>} : memref<8x8x32xf32, #tpu.memory_space<vmem>>, vector<1x8x32xf32>,
    %c8_i32_76 = arith.constant 8 : i32
    %c0_77 = arith.constant 0 : index
    %c0_78 = arith.constant 0 : index
    %290 = vector.load %arg10[%c0_77, %c0_78] : memref<8x32xf32, #tpu.memory_space<vmem>>, vector<8x32xf32>
    tpu.vector_store %arg10[%c0_77, %c0_78], %285 {strides = array<i32>} : memref<8x32xf32, #tpu.memory_space<vmem>>, vector<8x32xf32>,
    %c0_79 = arith.constant 0 : index
    %c0_80 = arith.constant 0 : index
    %291 = vector.load %arg11[%c0_79, %c0_80] : memref<8x32xf32, #tpu.memory_space<vmem>>, vector<8x32xf32>
    tpu.vector_store %arg11[%c0_79, %c0_80], %283 {strides = array<i32>} : memref<8x32xf32, #tpu.memory_space<vmem>>, vector<8x32xf32>,
    %c0_81 = arith.constant 0 : index
    %c0_82 = arith.constant 0 : index
    %c0_83 = arith.constant 0 : index
    %292 = vector.load %arg13[%c0_81, %c0_82, %c0_83] : memref<8x8x32xf32, #tpu.memory_space<vmem>>, vector<8x8x32xf32>
    %293 = math.tanh %292 : vector<8x8x32xf32>
    %c0_84 = arith.constant 0 : index
    %c0_85 = arith.constant 0 : index
    %c0_86 = arith.constant 0 : index
    %294 = vector.load %arg7[%c0_84, %c0_85, %c0_86] : memref<1x1x32xf32, #tpu.memory_space<vmem>>, vector<1x1x32xf32>
    %295 = vector.broadcast %294 : vector<1x1x32xf32> to vector<8x8x32xf32>
    %296 = arith.mulf %293, %295 : vector<8x8x32xf32>
    %cst_87 = arith.constant dense<0.000000e+00> : vector<8x8xf32>
    %297 = vector.multi_reduction <add>, %296, %cst_87 [2] : vector<8x8x32xf32> to vector<8x8xf32>
    %c0_88 = arith.constant 0 : index
    %c0_89 = arith.constant 0 : index
    %298 = vector.load %arg8[%c0_88, %c0_89] : memref<1x1xf32, #tpu.memory_space<vmem>>, vector<1x1xf32>
    %299 = vector.broadcast %298 : vector<1x1xf32> to vector<8x8xf32>
    %300 = arith.addf %297, %299 : vector<8x8xf32>
    %c0_90 = arith.constant 0 : index
    %c0_91 = arith.constant 0 : index
    %301 = vector.load %arg9[%c0_90, %c0_91] : memref<8x8xf32, #tpu.memory_space<vmem>>, vector<8x8xf32>
    tpu.vector_store %arg9[%c0_90, %c0_91], %300 {strides = array<i32>} : memref<8x8xf32, #tpu.memory_space<vmem>>, vector<8x8xf32>,
    return
  }
  func.func @transform_0(%arg0: i32) -> (i32, i32) {
    %c0_i32 = arith.constant 0 : i32
    %c0_i32_0 = arith.constant 0 : i32
    %c0_i32_1 = arith.constant 0 : i32
    return %c0_i32, %c0_i32_0 : i32, i32
  }
  func.func @transform_1(%arg0: i32) -> (i32, i32) {
    %c0_i32 = arith.constant 0 : i32
    %c0_i32_0 = arith.constant 0 : i32
    %c0_i32_1 = arith.constant 0 : i32
    return %c0_i32, %c0_i32_0 : i32, i32
  }
  func.func @transform_2(%arg0: i32) -> (i32, i32) {
    %c0_i32 = arith.constant 0 : i32
    %c0_i32_0 = arith.constant 0 : i32
    %c0_i32_1 = arith.constant 0 : i32
    return %c0_i32, %c0_i32_0 : i32, i32
  }
  func.func @transform_3(%arg0: i32) -> (i32, i32) {
    %c0_i32 = arith.constant 0 : i32
    %c0_i32_0 = arith.constant 0 : i32
    %c0_i32_1 = arith.constant 0 : i32
    return %c0_i32, %c0_i32_0 : i32, i32
  }
  func.func @transform_4(%arg0: i32) -> (i32, i32) {
    %c0_i32 = arith.constant 0 : i32
    %c0_i32_0 = arith.constant 0 : i32
    %c0_i32_1 = arith.constant 0 : i32
    return %c0_i32, %c0_i32_0 : i32, i32
  }
  func.func @transform_5(%arg0: i32) -> (i32, i32) {
    %c0_i32 = arith.constant 0 : i32
    %c0_i32_0 = arith.constant 0 : i32
    %c0_i32_1 = arith.constant 0 : i32
    return %c0_i32, %c0_i32_0 : i32, i32
  }
  func.func @transform_6(%arg0: i32) -> (i32, i32, i32) {
    %c0_i32 = arith.constant 0 : i32
    %c0_i32_0 = arith.constant 0 : i32
    %c0_i32_1 = arith.constant 0 : i32
    %c0_i32_2 = arith.constant 0 : i32
    return %c0_i32, %c0_i32_0, %c0_i32_1 : i32, i32, i32
  }
  func.func @transform_7(%arg0: i32) -> (i32, i32) {
    %c0_i32 = arith.constant 0 : i32
    %c0_i32_0 = arith.constant 0 : i32
    %c0_i32_1 = arith.constant 0 : i32
    return %c0_i32, %c0_i32_0 : i32, i32
  }
  func.func @transform_8(%arg0: i32) -> (i32, i32) {
    %c0_i32 = arith.constant 0 : i32
    %c0_i32_0 = arith.constant 0 : i32
    %c0_i32_1 = arith.constant 0 : i32
    return %c0_i32, %c0_i32_0 : i32, i32
  }
  func.func @transform_9(%arg0: i32) -> (i32, i32) {
    %c0_i32 = arith.constant 0 : i32
    %c0_i32_0 = arith.constant 0 : i32
    %c0_i32_1 = arith.constant 0 : i32
    return %c0_i32, %c0_i32_0 : i32, i32
  }
  func.func @transform_10(%arg0: i32) -> (i32, i32) {
    %c0_i32 = arith.constant 0 : i32
    %c0_i32_0 = arith.constant 0 : i32
    %c0_i32_1 = arith.constant 0 : i32
    return %c0_i32, %c0_i32_0 : i32, i32
  }
}

</mosaic_0001>

<bundles_post_ra>
// kernel: rnn_decoder_forward.1
= control target key start
LH: loop header
LB: loop body
LE: loop exit
PB: predicated region body
PF: predicated region fallthrough
CT: control target
= control target key end

     0   :  { %v1521_v2 = vmov 0.0|0.0   ;;  %vm53_vm0 = vcmask 261120   ;;  %vm1522_vm1 = vmmov 0   ;;  %v1523_v4 = vmov 0.0   ;;  %s1524_s14 = smov 64   ;;  %s1525_s17 = smov 32   ;;  %s1800_s3 = inlined_call_operand.vmem [shape: f32[32,128], index: 3, kind: input, shape index: {}]   ;;  %s1801_s4 = inlined_call_operand.vmem [shape: f32[32,128], index: 4, kind: input, shape index: {}]   ;;  %s1802_s0 = inlined_call_operand.vmem [shape: f32[64,32], index: 0, kind: input, shape index: {}]   ;;  %s1803_s1 = inlined_call_operand.vmem [shape: f32[8,32], index: 1, kind: input, shape index: {}]   ;;  %s1804_s5 = inlined_call_operand.vmem [shape: f32[1,128], index: 5, kind: input, shape index: {}]   ;;  %s1805_s2 = inlined_call_operand.vmem [shape: f32[8,32], index: 2, kind: input, shape index: {}]   ;;  %s1806_s6 = inlined_call_operand.vmem [shape: f32[1,1,32], index: 6, kind: input, shape index: {}]   ;;  %s1807_s7 = inlined_call_operand.<no memory space> [shape: f32[1,1], index: 7, kind: input, shape index: {}]   ;;  %s1808_s9 = inlined_call_operand.vmem [shape: f32[8,32], index: 9, kind: output, shape index: {1}]   ;;  %s1809_s10 = inlined_call_operand.vmem [shape: f32[8,32], index: 10, kind: output, shape index: {2}]   ;;  %s1810_s8 = inlined_call_operand.vmem [shape: f32[8,8], index: 8, kind: output, shape index: {0}]  }
   0x1   :  { %v42_v0 = vld [vmem:[%s1800_s3] sm:$0xff]  ;;  %v43_v1 = vld [vmem:[%s1800_s3 + $0x8] sm:$0xff]  ;;  %1385 = vmatprep.subr.bf16.mxu1 %v1521_v2  ;;  %1297 = vmatprep.mubr.msk.f32.mxu1 %vm1522_vm1, %v1523_v4  ;;  %v44_v7 = vld [vmem:[%s1800_s3 + $0x10] sm:$0xff]  ;;  %vm1161_vm2 = vcmask 1041409   ;;  %vm1163_vm3 = vcmask 1042434   ;;  %vm1165_vm4 = vcmask 1043459  }
   0x2   :  { %v191_v3 = vld [vmem:[%s1801_s4] sm:$0xff]  ;;  %v1377_v5 = vpack.c.bf16 %v43_v1, %v42_v0  ;;  %v192_v6 = vld [vmem:[%s1801_s4 + $0x8] sm:$0xff]  ;;  %v45_v8 = vld [vmem:[%s1800_s3 + $0x18] sm:$0xff]  ;;  %s1527_s3 = smov 96   ;;  %vm1167_vm5 = vcmask 1044484   ;;  %vm1169_vm6 = vcmask 1045509  }
   0x3   :  { %v1604_v9 = vpack.c.bf16 %v192_v6, %v191_v3  ;;  %v1381_v10 = vpack.c.bf16 %v45_v8, %v44_v7  ;;  %v34_v11 = vld [vmem:[%s1802_s0] sm:$0xff]  ;;  %v193_v12 = vld [vmem:[%s1801_s4 + $0x10] sm:$0xff]  ;;  %v194_v13 = vld [vmem:[%s1801_s4 + $0x18] sm:$0xff]  ;;  %vm1171_vm7 = vcmask 1046534   ;;  %vm1173_vm8 = vcmask 1047559  }
   0x4   :  { %1378 = vmatprep.subr.bf16.mxu0 %v1377_v5  ;;  %1277 = vmatprep.mubr.msk.f32.mxu0 %vm53_vm0, %v34_v11  ;;  %v1617_v14 = vpack.c.bf16 %v194_v13, %v193_v12  ;;  %v35_v15 = vld [vmem:[%s1802_s0 + $0x8] sm:$0xff]  ;;  %v195_v16 = vld [vmem:[%s1803_s1] sm:$0xff]  ;;  %v36_v54 = vld [vmem:[%s1802_s0 + $0x10] sm:$0xff]  ;;  %vm1176_vm9 = vcmask 64512  }
   0x5   :  { %1380 = vmatpush3.bf16.msra.mxu0 %v1377_v5  ;;  %1387 = vmatpush3.bf16.msra.mxu1 %v1604_v9  ;;  %v1644_v17 = vld [vmem:[%s1804_s5] ss:$0 sm:$0xff]  ;;  %v37_v55 = vld [vmem:[%s1802_s0 + $0x18] sm:$0xff]  ;;  %v39_v57 = vld [vmem:[%s1802_s0 + $0x28] sm:$0xff] }
   0x6   :  { %1382 = vmatprep.subr.bf16.mxu0 %v1381_v10  ;;  %1388 = vmatprep.subr.bf16.mxu1 %v1521_v2  ;;  %v196_v25 = vld [vmem:[%s1805_s2] sm:$0xff]  ;;  %v40_v58 = vld [vmem:[%s1802_s0 + $0x30] sm:$0xff]  ;;  %v41_v59 = vld [vmem:[%s1802_s0 + $0x38] sm:$0xff] }
   0x7   :  { %v38_v56 = vld [vmem:[%s1802_s0 + $0x20] sm:$0xff] }
   0x9   :  { %1384 = vmatpush3.bf16.msra.mxu0 %v1381_v10  ;;  %1390 = vmatpush3.bf16.msra.mxu1 %v1617_v14 }
   0xa   :  { %1391 = vmatprep.subr.bf16.mxu1 %v1521_v2  ;;  %1397 = vmatprep.subr.bf16.mxu0 %v1521_v2 }
   0xc   :  { %1278 = vmatmul.mubr.msk.f32.vlgmr.msra.gmra.mrb[0].mxu0 %vm53_vm0, %v35_v15  ;;  %1298 = vmatmul.mubr.msk.f32.vlgmr.msra.gmra.mrb[0].mxu1 %vm53_vm0, %v195_v16 }
   0xd   :  { %1393 = vmatpush3.bf16.msra.mxu1 %v1604_v9  ;;  %1308 = vmatprep.mubr.msk.f32.mxu1 %vm1522_vm1, %v1523_v4 }
   0xe   :  { %1394 = vmatprep.subr.bf16.mxu1 %v1521_v2  ;;  %1399 = vmatpush3.bf16.msra.mxu0 %v1604_v9 }
   0xf   :  { %1400 = vmatprep.subr.bf16.mxu0 %v1521_v2  ;;  %1280 = vmatprep.mubr.msk.f32.mxu0 %vm53_vm0, %v36_v54 }
  0x10   :  { %1281 = vmatmul.mubr.msk.f32.gmra.mrb[2].mxu0 %vm53_vm0, %v37_v55 }
  0x11   :  { %1396 = vmatpush3.bf16.msra.mxu1 %v1617_v14  ;;  %1283 = vmatprep.mubr.msk.f32.mxu0 %vm53_vm0, %v38_v56 }
  0x12   :  { %1402 = vmatpush3.bf16.msra.mxu0 %v1617_v14  ;;  %1403 = vmatprep.subr.bf16.mxu1 %v1521_v2 }
  0x13   :  { %1409 = vmatprep.subr.bf16.mxu0 %v1521_v2 }
  0x14   :  { %1284 = vmatmul.mubr.msk.f32.gmra.mrb[4].mxu0 %vm53_vm0, %v39_v57 }
  0x15   :  { %1286 = vmatprep.mubr.msk.f32.mxu0 %vm53_vm0, %v40_v58 }
  0x18   :  { %1287 = vmatmul.mubr.msk.f32.gmra.mrb[6].mxu0 %vm53_vm0, %v41_v59 }
  0x19   :  { %1319 = vmatprep.mubr.msk.f32.mxu0 %vm1522_vm1, %v1523_v4 }
  0xdf   :  { %v1279_v18 = vpop.f32.mrb[0].mxu0  ;;  %v267_v19 = vpop.f32.mrb[0].mxu1 }
  0xe0   :  { %v144_v20 = vpop.f32.mrb[1].mxu0  ;;  %v1299_v21 = vpop.f32.mrb[1].mxu1  ;;  %v150_v40 = vadd.f32 %v1279_v18, %v1644_v17 }
  0xe1   :  { %v145_v22 = vadd.f32 %v1644_v17, %v144_v20 }
  0xe3   :  { %v271_v23 = vadd.f32 %v267_v19, %v145_v22  ;;  %v1282_v63 = vpop.f32.mrb[2].mxu0 }
  0xe4   :  { %v154_v0 = vpop.f32.mrb[3].mxu0 }
  0xe5   :  { %1441 = vtanh.f32 %v271_v23  ;;  %v1200_v26 = vmul.f32 -1.442695, %v271_v23  ;;  %v155_v8 = vadd.f32 %v1644_v17, %v154_v0 }
  0xe7   :  { %1443 = vpow2.f32 %v1200_v26  ;;  %v1694_v1 = vpop.f32.mrb[4].mxu0 }
  0xe8   :  { %v1696_v3 = vpop.f32.mrb[5].mxu0 }
  0xeb   :  { %v1698_v5 = vpop.f32.mrb[6].mxu0 }
  0xec   :  { %v1700_v6 = vpop.f32.mrb[7].mxu0 }
  0xef   :  { %v1442_v24 = vpop.eup %1441 }
  0xf0   :  { %285 = vrot.lane.b32.xlu0 %v1442_v24, %s1524_s14 }
  0xf1   :  { %v1444_v27 = vpop.eup %1443 }
  0xf2   :  { %v275_v28 = vadd.f32 1.0, %v1444_v27 }
  0xf4   :  { %280 = vrot.lane.b32.xlu0 %v196_v25, %s1525_s17  ;;  %1445 = vrcp.f32 %v275_v28 }
  0xfe   :  { %v1446_v29 = vpop.eup %1445 }
 0x162   :  { %v286_v30 = vpop.permute.xlu0 %285 }
 0x163   :  { %v288_v31 = vmul.f32 %v1446_v29, %v286_v30 }
 0x165   :  { %290 = vrot.lane.b32.xlu1 %v288_v31, %s1525_s17 }
 0x166   :  { %v281_v32 = vpop.permute.xlu0 %280 }
 0x167   :  { %v283_v33 = vmul.f32 %v1446_v29, %v281_v32 }
 0x1d7   :  { %v291_v34 = vpop.permute.xlu1 %290 }
 0x1d8   :  { %v293_v35 = vadd.f32 %v291_v34, %v283_v33 }
 0x1da   :  { %1447 = vtanh.f32 %v293_v35 }
 0x1e4   :  { %v1448_v36 = vpop.eup %1447 }
 0x1e5   :  { %296 = vrot.lane.b32.xlu1 %v1448_v36, %s1524_s14 }
 0x257   :  { %v297_v37 = vpop.permute.xlu1 %296 }
 0x258   :  { %v299_v38 = vmul.f32 %v1446_v29, %v297_v37  ;;  %v160_v29 = vadd.f32 %v1282_v63, %v1644_v17 }
 0x25a   :  { %301 = vrot.lane.b32.xlu0 %v299_v38, %s1525_s17 }
 0x2cc   :  { %v302_v39 = vpop.permute.xlu0 %301 }
 0x2cd   :  { %304 = vst.msk [vmem:[#allocation3] sm:$0xff] %vm53_vm0, %v302_v39  ;;  %1309 = vmatmul.mubr.msk.f32.vlgmr.msra.gmra.mrb[2].mxu1 %vm53_vm0, %v302_v39 }
 0x2ce   :  { %1405 = vmatpush3.bf16.msra.mxu1 %v1604_v9  ;;  %1330 = vmatprep.mubr.msk.f32.mxu1 %vm1522_vm1, %v1523_v4 }
 0x2cf   :  { %1406 = vmatprep.subr.bf16.mxu1 %v1521_v2 }
 0x2d2   :  { %1408 = vmatpush3.bf16.msra.mxu1 %v1617_v14 }
 0x2d3   :  { %1415 = vmatprep.subr.bf16.mxu1 %v1521_v2 }
 0x3a0   :  { %v375_v41 = vpop.f32.mrb[2].mxu1 }
 0x3a1   :  { %v379_v42 = vadd.f32 %v375_v41, %v150_v40  ;;  %v1310_v43 = vpop.f32.mrb[3].mxu1 }
 0x3a3   :  { %1449 = vtanh.f32 %v379_v42  ;;  %v1202_v45 = vmul.f32 -1.442695, %v379_v42 }
 0x3a5   :  { %1451 = vpow2.f32 %v1202_v45 }
 0x3ad   :  { %v1450_v44 = vpop.eup %1449 }
 0x3ae   :  { %389 = vrot.lane.b32.xlu1 %v1450_v44, %s1524_s14 }
 0x3af   :  { %v1452_v46 = vpop.eup %1451 }
 0x3b0   :  { %v383_v47 = vadd.f32 1.0, %v1452_v46 }
 0x3b2   :  { %1453 = vrcp.f32 %v383_v47  ;;  %v165_v47 = vadd.f32 %v1644_v17, %v1696_v3  ;;  %v170_v3 = vadd.f32 %v1694_v1, %v1644_v17 }
 0x3bc   :  { %v1454_v48 = vpop.eup %1453 }
 0x3bd   :  { %v387_v51 = vmul.f32 %v1454_v48, %v293_v35 }
 0x420   :  { %v390_v49 = vpop.permute.xlu1 %389 }
 0x421   :  { %v392_v50 = vmul.f32 %v1454_v48, %v390_v49 }
 0x423   :  { %394 = vrot.lane.b32.xlu0 %v392_v50, %s1525_s17 }
 0x495   :  { %v395_v52 = vpop.permute.xlu0 %394 }
 0x496   :  { %v397_v53 = vadd.f32 %v395_v52, %v387_v51 }
 0x498   :  { %1455 = vtanh.f32 %v397_v53 }
 0x4a2   :  { %v1456_v60 = vpop.eup %1455 }
 0x4a3   :  { %400 = vrot.lane.b32.xlu1 %v1456_v60, %s1524_s14 }
 0x515   :  { %v401_v61 = vpop.permute.xlu1 %400 }
 0x516   :  { %v403_v62 = vmul.f32 %v1454_v48, %v401_v61 }
 0x518   :  { %405 = vrot.lane.b32.xlu0 %v403_v62, %s1525_s17 }
 0x58a   :  { %v406_v7 = vpop.permute.xlu0 %405 }
 0x58b   :  { %409 = vst.msk [vmem:[#allocation3 + $0x8] sm:$0xff] %vm53_vm0, %v406_v7  ;;  %1320 = vmatmul.mubr.msk.f32.vlgmr.msra.gmra.mrb[8].mxu0 %vm53_vm0, %v406_v7 }
 0x58c   :  { %1411 = vmatpush3.bf16.msra.mxu0 %v1604_v9  ;;  %1341 = vmatprep.mubr.msk.f32.mxu0 %vm1522_vm1, %v1523_v4 }
 0x58d   :  { %1412 = vmatprep.subr.bf16.mxu0 %v1521_v2 }
 0x590   :  { %1414 = vmatpush3.bf16.msra.mxu0 %v1617_v14 }
 0x591   :  { %1421 = vmatprep.subr.bf16.mxu0 %v1521_v2 }
 0x65e   :  { %v480_v10 = vpop.f32.mrb[8].mxu0 }
 0x65f   :  { %v484_v11 = vadd.f32 %v480_v10, %v155_v8  ;;  %v1321_v12 = vpop.f32.mrb[9].mxu0 }
 0x661   :  { %1457 = vtanh.f32 %v484_v11  ;;  %v1204_v15 = vmul.f32 -1.442695, %v484_v11 }
 0x663   :  { %1459 = vpow2.f32 %v1204_v15 }
 0x66b   :  { %v1458_v13 = vpop.eup %1457 }
 0x66c   :  { %494 = vrot.lane.b32.xlu1 %v1458_v13, %s1524_s14 }
 0x66d   :  { %v1460_v16 = vpop.eup %1459 }
 0x66e   :  { %v488_v18 = vadd.f32 1.0, %v1460_v16 }
 0x670   :  { %1461 = vrcp.f32 %v488_v18 }
 0x67a   :  { %v1462_v19 = vpop.eup %1461 }
 0x67b   :  { %v492_v22 = vmul.f32 %v1462_v19, %v397_v53 }
 0x6de   :  { %v495_v20 = vpop.permute.xlu1 %494 }
 0x6df   :  { %v497_v21 = vmul.f32 %v1462_v19, %v495_v20 }
 0x6e1   :  { %499 = vrot.lane.b32.xlu0 %v497_v21, %s1525_s17 }
 0x753   :  { %v500_v23 = vpop.permute.xlu0 %499 }
 0x754   :  { %v502_v24 = vadd.f32 %v500_v23, %v492_v22  ;;  %v175_v22 = vadd.f32 %v1644_v17, %v1700_v6 }
 0x756   :  { %1463 = vtanh.f32 %v502_v24 }
 0x760   :  { %v1464_v25 = vpop.eup %1463 }
 0x761   :  { %505 = vrot.lane.b32.xlu1 %v1464_v25, %s1524_s14 }
 0x7d3   :  { %v506_v26 = vpop.permute.xlu1 %505 }
 0x7d4   :  { %v508_v27 = vmul.f32 %v1462_v19, %v506_v26 }
 0x7d6   :  { %510 = vrot.lane.b32.xlu0 %v508_v27, %s1525_s17 }
 0x848   :  { %v511_v28 = vpop.permute.xlu0 %510 }
 0x849   :  { %514 = vst.msk [vmem:[#allocation3 + $0x10] sm:$0xff] %vm53_vm0, %v511_v28  ;;  %1331 = vmatmul.mubr.msk.f32.vlgmr.msra.gmra.mrb[4].mxu1 %vm53_vm0, %v511_v28 }
 0x84a   :  { %1417 = vmatpush3.bf16.msra.mxu1 %v1604_v9  ;;  %1352 = vmatprep.mubr.msk.f32.mxu1 %vm1522_vm1, %v1523_v4 }
 0x84b   :  { %1418 = vmatprep.subr.bf16.mxu1 %v1521_v2 }
 0x84e   :  { %1420 = vmatpush3.bf16.msra.mxu1 %v1617_v14 }
 0x84f   :  { %1427 = vmatprep.subr.bf16.mxu1 %v1521_v2 }
 0x91c   :  { %v585_v30 = vpop.f32.mrb[4].mxu1 }
 0x91d   :  { %v589_v31 = vadd.f32 %v585_v30, %v160_v29  ;;  %v1332_v32 = vpop.f32.mrb[5].mxu1 }
 0x91f   :  { %1465 = vtanh.f32 %v589_v31  ;;  %v1206_v34 = vmul.f32 -1.442695, %v589_v31 }
 0x921   :  { %1467 = vpow2.f32 %v1206_v34 }
 0x929   :  { %v1466_v33 = vpop.eup %1465 }
 0x92a   :  { %599 = vrot.lane.b32.xlu1 %v1466_v33, %s1524_s14 }
 0x92b   :  { %v1468_v35 = vpop.eup %1467 }
 0x92c   :  { %v593_v36 = vadd.f32 1.0, %v1468_v35 }
 0x92e   :  { %1469 = vrcp.f32 %v593_v36 }
 0x938   :  { %v1470_v37 = vpop.eup %1469 }
 0x939   :  { %v597_v40 = vmul.f32 %v1470_v37, %v502_v24 }
 0x99c   :  { %v600_v38 = vpop.permute.xlu1 %599 }
 0x99d   :  { %v602_v39 = vmul.f32 %v1470_v37, %v600_v38 }
 0x99f   :  { %604 = vrot.lane.b32.xlu0 %v602_v39, %s1525_s17  ;;  %v180_v39 = vadd.f32 %v1698_v5, %v1644_v17 }
 0xa11   :  { %v605_v41 = vpop.permute.xlu0 %604 }
 0xa12   :  { %v607_v42 = vadd.f32 %v605_v41, %v597_v40 }
 0xa14   :  { %1471 = vtanh.f32 %v607_v42 }
 0xa1e   :  { %v1472_v43 = vpop.eup %1471 }
 0xa1f   :  { %610 = vrot.lane.b32.xlu1 %v1472_v43, %s1524_s14 }
 0xa91   :  { %v611_v44 = vpop.permute.xlu1 %610 }
 0xa92   :  { %v613_v45 = vmul.f32 %v1470_v37, %v611_v44 }
 0xa94   :  { %615 = vrot.lane.b32.xlu0 %v613_v45, %s1525_s17 }
 0xb06   :  { %v616_v46 = vpop.permute.xlu0 %615 }
 0xb07   :  { %619 = vst.msk [vmem:[#allocation3 + $0x18] sm:$0xff] %vm53_vm0, %v616_v46  ;;  %1342 = vmatmul.mubr.msk.f32.vlgmr.msra.gmra.mrb[10].mxu0 %vm53_vm0, %v616_v46 }
 0xb08   :  { %1423 = vmatpush3.bf16.msra.mxu0 %v1604_v9  ;;  %1363 = vmatprep.mubr.msk.f32.mxu0 %vm1522_vm1, %v1523_v4 }
 0xb09   :  { %1424 = vmatprep.subr.bf16.mxu0 %v1521_v2 }
 0xb0c   :  { %1426 = vmatpush3.bf16.msra.mxu0 %v1617_v14 }
 0xbda   :  { %v690_v48 = vpop.f32.mrb[10].mxu0 }
 0xbdb   :  { %v694_v49 = vadd.f32 %v690_v48, %v165_v47  ;;  %v1343_v50 = vpop.f32.mrb[11].mxu0 }
 0xbdd   :  { %1473 = vtanh.f32 %v694_v49  ;;  %v1208_v52 = vmul.f32 -1.442695, %v694_v49 }
 0xbdf   :  { %1475 = vpow2.f32 %v1208_v52  ;;  %v1046_v52 = vld [vmem:[#allocation3] sm:$0xff] }
 0xbe7   :  { %v1474_v51 = vpop.eup %1473 }
 0xbe8   :  { %704 = vrot.lane.b32.xlu1 %v1474_v51, %s1524_s14 }
 0xbe9   :  { %v1476_v53 = vpop.eup %1475 }
 0xbea   :  { %v698_v54 = vadd.f32 1.0, %v1476_v53  ;;  %v1049_v53 = vld [vmem:[#allocation3 + $0x18] sm:$0xff] }
 0xbec   :  { %1477 = vrcp.f32 %v698_v54 }
 0xbf6   :  { %v1478_v55 = vpop.eup %1477 }
 0xbf7   :  { %v702_v58 = vmul.f32 %v1478_v55, %v607_v42 }
 0xc5a   :  { %v705_v56 = vpop.permute.xlu1 %704 }
 0xc5b   :  { %v707_v57 = vmul.f32 %v1478_v55, %v705_v56  ;;  %v1215_v56 = vld [vmem:[%s1806_s6] ss:$0 sm:$0xff] }
 0xc5d   :  { %709 = vrot.lane.b32.xlu0 %v707_v57, %s1525_s17 }
 0xccf   :  { %v710_v59 = vpop.permute.xlu0 %709 }
 0xcd0   :  { %v712_v60 = vadd.f32 %v710_v59, %v702_v58 }
 0xcd2   :  { %1479 = vtanh.f32 %v712_v60 }
 0xcdc   :  { %v1480_v61 = vpop.eup %1479 }
 0xcdd   :  { %715 = vrot.lane.b32.xlu1 %v1480_v61, %s1524_s14 }
 0xd4f   :  { %v716_v62 = vpop.permute.xlu1 %715 }
 0xd50   :  { %v718_v63 = vmul.f32 %v1478_v55, %v716_v62 }
 0xd52   :  { %720 = vrot.lane.b32.xlu0 %v718_v63, %s1525_s17 }
 0xdc4   :  { %v721_v0 = vpop.permute.xlu0 %720 }
 0xdc5   :  { %724 = vst.msk [vmem:[#allocation3 + $0x20] sm:$0xff] %vm53_vm0, %v721_v0  ;;  %1353 = vmatmul.mubr.msk.f32.vlgmr.msra.gmra.mrb[6].mxu1 %vm53_vm0, %v721_v0 }
 0xdc6   :  { %1429 = vmatpush3.bf16.msra.mxu1 %v1604_v9  ;;  %1374 = vmatprep.mubr.msk.f32.mxu1 %vm1522_vm1, %v1523_v4 }
 0xdc7   :  { %1430 = vmatprep.subr.bf16.mxu1 %v1521_v2 }
 0xdca   :  { %1432 = vmatpush3.bf16.msra.mxu1 %v1617_v14 }
 0xe98   :  { %v795_v7 = vpop.f32.mrb[6].mxu1 }
 0xe99   :  { %v799_v8 = vadd.f32 %v795_v7, %v170_v3  ;;  %v1354_v10 = vpop.f32.mrb[7].mxu1  ;;  %v16_v3 = vstv %s1807_s7  ;;  %v1526_v7 = vmov 0  }
 0xe9a   :  { %17 = vst [vmem:[#allocation4] sm:$0x1] %v16_v3  ;;  %1440 = vset.pattern.permute.xlu0 %v1526_v7 }
 0xe9b   :  { %1481 = vtanh.f32 %v799_v8  ;;  %v1210_v12 = vmul.f32 -1.442695, %v799_v8 }
 0xe9d   :  { %1483 = vpow2.f32 %v1210_v12  ;;  %v1048_v12 = vld [vmem:[#allocation3 + $0x10] sm:$0xff] }
 0xea5   :  { %v1482_v11 = vpop.eup %1481 }
 0xea6   :  { %809 = vrot.lane.b32.xlu1 %v1482_v11, %s1524_s14  ;;  %v1047_v11 = vld [vmem:[#allocation3 + $0x8] sm:$0xff] }
 0xea7   :  { %v1484_v9 = vpop.eup %1483 }
 0xea8   :  { %v803_v13 = vadd.f32 1.0, %v1484_v9  ;;  %v1050_v9 = vld [vmem:[#allocation3 + $0x20] sm:$0xff] }
 0xeaa   :  { %1485 = vrcp.f32 %v803_v13 }
 0xeb4   :  { %v1486_v4 = vpop.eup %1485 }
 0xeb5   :  { %v807_v14 = vmul.f32 %v1486_v4, %v712_v60 }
 0xf18   :  { %v810_v15 = vpop.permute.xlu1 %809 }
 0xf19   :  { %v812_v2 = vmul.f32 %v1486_v4, %v810_v15 }
 0xf1b   :  { %814 = vrot.lane.b32.xlu0 %v812_v2, %s1525_s17 }
 0xf8d   :  { %v815_v16 = vpop.permute.xlu0 %814 }
 0xf8e   :  { %v817_v1 = vadd.f32 %v815_v16, %v807_v14 }
 0xf90   :  { %1487 = vtanh.f32 %v817_v1 }
 0xf9a   :  { %v1488_v18 = vpop.eup %1487 }
 0xf9b   :  { %820 = vrot.lane.b32.xlu1 %v1488_v18, %s1524_s14 }
0x100d   :  { %v821_v19 = vpop.permute.xlu1 %820 }
0x100e   :  { %v823_v20 = vmul.f32 %v1486_v4, %v821_v19 }
0x1010   :  { %825 = vrot.lane.b32.xlu0 %v823_v20, %s1525_s17 }
0x1082   :  { %v826_v21 = vpop.permute.xlu0 %825 }
0x1083   :  { %829 = vst.msk [vmem:[#allocation3 + $0x28] sm:$0xff] %vm53_vm0, %v826_v21  ;;  %1364 = vmatmul.mubr.msk.f32.vlgmr.msra.gmra.mrb[12].mxu0 %vm53_vm0, %v826_v21 }
0x108a   :  { %v1051_v54 = vld [vmem:[#allocation3 + $0x28] sm:$0xff] }
0x1156   :  { %v900_v23 = vpop.f32.mrb[12].mxu0 }
0x1157   :  { %v904_v24 = vadd.f32 %v900_v23, %v175_v22  ;;  %v1365_v25 = vpop.f32.mrb[13].mxu0 }
0x1159   :  { %1489 = vtanh.f32 %v904_v24  ;;  %v1212_v27 = vmul.f32 -1.442695, %v904_v24  ;;  %v1216_v24 = vld [vmem:[#allocation4] ss:$0 sm:$0xff] }
0x115b   :  { %1491 = vpow2.f32 %v1212_v27 }
0x1163   :  { %v1490_v26 = vpop.eup %1489 }
0x1164   :  { %914 = vrot.lane.b32.xlu1 %v1490_v26, %s1524_s14 }
0x1165   :  { %v1492_v28 = vpop.eup %1491 }
0x1166   :  { %v908_v29 = vadd.f32 1.0, %v1492_v28 }
0x1168   :  { %1493 = vrcp.f32 %v908_v29 }
0x1172   :  { %v1494_v30 = vpop.eup %1493 }
0x1173   :  { %v912_v33 = vmul.f32 %v1494_v30, %v817_v1 }
0x11d6   :  { %v915_v31 = vpop.permute.xlu1 %914 }
0x11d7   :  { %v917_v32 = vmul.f32 %v1494_v30, %v915_v31 }
0x11d9   :  { %919 = vrot.lane.b32.xlu0 %v917_v32, %s1525_s17 }
0x124b   :  { %v920_v34 = vpop.permute.xlu0 %919 }
0x124c   :  { %v922_v6 = vadd.f32 %v920_v34, %v912_v33  ;;  %v1127_v33 = vlaneseq }
0x124e   :  { %1495 = vtanh.f32 %v922_v6 }
0x1258   :  { %v1496_v35 = vpop.eup %1495 }
0x1259   :  { %925 = vrot.lane.b32.xlu1 %v1496_v35, %s1524_s14  ;;  %v1130_v35 = vshrl.u32 %v1127_v33, 7 }
0x12cb   :  { %v926_v36 = vpop.permute.xlu1 %925 }
0x12cc   :  { %v928_v37 = vmul.f32 %v1494_v30, %v926_v36 }
0x12ce   :  { %930 = vrot.lane.b32.xlu0 %v928_v37, %s1525_s17 }
0x1340   :  { %v931_v38 = vpop.permute.xlu0 %930 }
0x1341   :  { %934 = vst.msk [vmem:[#allocation3 + $0x30] sm:$0xff] %vm53_vm0, %v931_v38  ;;  %1375 = vmatmul.mubr.msk.f32.vlgmr.msra.gmra.mrb[8].mxu1 %vm53_vm0, %v931_v38 }
0x1348   :  { %v1052_v13 = vld [vmem:[#allocation3 + $0x30] sm:$0xff] }
0x1414   :  { %v1005_v40 = vpop.f32.mrb[8].mxu1 }
0x1415   :  { %v1009_v41 = vadd.f32 %v1005_v40, %v180_v39  ;;  %v1376_v42 = vpop.f32.mrb[9].mxu1 }
0x1417   :  { %1497 = vtanh.f32 %v1009_v41  ;;  %v1214_v44 = vmul.f32 -1.442695, %v1009_v41 }
0x1419   :  { %1499 = vpow2.f32 %v1214_v44 }
0x1421   :  { %v1498_v43 = vpop.eup %1497 }
0x1422   :  { %1019 = vrot.lane.b32.xlu1 %v1498_v43, %s1524_s14 }
0x1423   :  { %v1500_v45 = vpop.eup %1499 }
0x1424   :  { %v1013_v46 = vadd.f32 1.0, %v1500_v45 }
0x1426   :  { %1501 = vrcp.f32 %v1013_v46 }
0x1430   :  { %v1502_v47 = vpop.eup %1501 }
0x1431   :  { %v1017_v50 = vmul.f32 %v1502_v47, %v922_v6  ;;  %v1128_v6 = vand.u32 127, %v1127_v33 }
0x1433   :  { %v1131_v38 = vsub.s32 %v1128_v6, %v1130_v35 }
0x1494   :  { %v1020_v48 = vpop.permute.xlu1 %1019 }
0x1495   :  { %v1022_v49 = vmul.f32 %v1502_v47, %v1020_v48 }
0x1497   :  { %1024 = vrot.lane.b32.xlu0 %v1022_v49, %s1525_s17 }
0x1509   :  { %v1025_v51 = vpop.permute.xlu0 %1024 }
0x150a   :  { %v1768_v17 = vadd.f32 %v1025_v51, %v1017_v50 }
0x150c   :  { %1503 = vtanh.f32 %v1768_v17 }
0x150d   :  { %1505 = vtanh.f32 %v1046_v52 }
0x150e   :  { %1507 = vtanh.f32 %v1049_v53 }
0x150f   :  { %1509 = vtanh.f32 %v1051_v54 }
0x1510   :  { %1511 = vtanh.f32 %v1047_v11 }
0x1511   :  { %1513 = vtanh.f32 %v1048_v12 }
0x1512   :  { %1515 = vtanh.f32 %v1050_v9 }
0x1513   :  { %1517 = vtanh.f32 %v1052_v13 }
0x1516   :  { %v1504_v5 = vpop.eup %1503 }
0x1517   :  { %1030 = vrot.lane.b32.xlu1 %v1504_v5, %s1524_s14  ;;  %v1506_v55 = vpop.eup %1505 }
0x1518   :  { %v1069_v57 = vmul.f32 %v1506_v55, %v1215_v56  ;;  %v1508_v58 = vpop.eup %1507 }
0x1519   :  { %v1072_v60 = vmul.f32 %v1508_v58, %v1215_v56  ;;  %v1510_v61 = vpop.eup %1509 }
0x151a   :  { %v1077_v59 = vsel %vm53_vm0, %v1069_v57, 0.0  ;;  %v1074_v63 = vmul.f32 %v1510_v61, %v1215_v56  ;;  %v1512_v4 = vpop.eup %1511 }
0x151b   :  { %v1086_v62 = vsel %vm53_vm0, %v1072_v60, 0.0  ;;  %v1070_v15 = vmul.f32 %v1512_v4, %v1215_v56  ;;  %v1514_v2 = vpop.eup %1513 }
0x151c   :  { %v1092_v0 = vsel %vm53_vm0, %v1074_v63, 0.0  ;;  %v1071_v16 = vmul.f32 %v1514_v2, %v1215_v56  ;;  %v1516_v1 = vpop.eup %1515 }
0x151d   :  { %v1080_v14 = vsel %vm53_vm0, %v1070_v15, 0.0  ;;  %v1073_v19 = vmul.f32 %v1516_v1, %v1215_v56  ;;  %v1518_v20 = vpop.eup %1517 }
0x151e   :  { %v1083_v18 = vsel %vm53_vm0, %v1071_v16, 0.0  ;;  %v1075_v22 = vmul.f32 %v1518_v20, %v1215_v56 }
0x151f   :  { %v1089_v21 = vsel %vm53_vm0, %v1073_v19, 0.0 }
0x1520   :  { %v1095_v23 = vsel %vm53_vm0, %v1075_v22, 0.0 }
0x153b   :  { %1078 = vadd.xlane.f32.xlu1 %v1077_v59 }
0x153f   :  { %1087 = vadd.xlane.f32.xlu1 %v1086_v62 }
0x1543   :  { %1093 = vadd.xlane.f32.xlu1 %v1092_v0 }
0x1589   :  { %v1031_v8 = vpop.permute.xlu1 %1030 }
0x158a   :  { %v1033_v10 = vmul.f32 %v1502_v47, %v1031_v8 }
0x158c   :  { %1035 = vrot.lane.b32.xlu0 %v1033_v10, %s1525_s17 }
0x15ab   :  { %1081 = vadd.xlane.f32.xlu0 %v1080_v14 }
0x15af   :  { %1084 = vadd.xlane.f32.xlu0 %v1083_v18 }
0x15b3   :  { %1090 = vadd.xlane.f32.xlu0 %v1089_v21 }
0x15b7   :  { %1096 = vadd.xlane.f32.xlu0 %v1095_v23 }
0x15c8   :  { %v1079_v37 = vpop.xlane.xlu1 %1078 }
0x15cc   :  { %v1088_v44 = vpop.xlane.xlu1 %1087 }
0x15cd   :  { %1108 = vperm.xlu0 %1440, %v1216_v24  }
0x15d0   :  { %v1094_v51 = vpop.xlane.xlu1 %1093 }
0x15fe   :  { %v1036_v25 = vpop.permute.xlu0 %1035 }
0x15ff   :  { %1039 = vst.msk [vmem:[#allocation3 + $0x38] sm:$0xff] %vm53_vm0, %v1036_v25  ;;  %1040 = vst.msk [vmem:[%s1808_s9] sm:$0xff] %vm53_vm0, %v1036_v25 }
0x1606   :  { %v1053_v26 = vld [vmem:[#allocation3 + $0x38] sm:$0xff] }
0x1607   :  { %1519 = vtanh.f32 %v1053_v26 }
0x1611   :  { %v1520_v27 = vpop.eup %1519 }
0x1612   :  { %v1076_v28 = vmul.f32 %v1520_v27, %v1215_v56 }
0x1614   :  { %v1098_v29 = vsel %vm53_vm0, %v1076_v28, 0.0 }
0x1615   :  { %1099 = vadd.xlane.f32.xlu1 %v1098_v29 }
0x1626   :  { %1042 = vrot.lane.b32.xlu1 %v1768_v17, %s1527_s3 }
0x1638   :  { %v1082_v30 = vpop.xlane.xlu0 %1081 }
0x163c   :  { %v1085_v31 = vpop.xlane.xlu0 %1084 }
0x1640   :  { %v1091_v32 = vpop.xlane.xlu0 %1090 }
0x1644   :  { %v1097_v34 = vpop.xlane.xlu0 %1096 }
0x164c   :  { %v1109_v36 = vpop.permute.xlu0 %1108 }
0x164d   :  { %v1111_v39 = vadd.f32 %v1109_v36, %v1079_v37  ;;  %v1112_v40 = vadd.f32 %v1109_v36, %v1082_v30  ;;  %v1113_v41 = vadd.f32 %v1109_v36, %v1085_v31  ;;  %v1114_v46 = vadd.f32 %v1109_v36, %v1088_v44 }
0x164e   :  { %v1115_v48 = vadd.f32 %v1109_v36, %v1091_v32  ;;  %v1116_v17 = vadd.f32 %v1109_v36, %v1094_v51  ;;  %v1117_v53 = vadd.f32 %v1109_v36, %v1097_v34 }
0x164f   :  { %v1132_v42 = vrot.slane %v1111_v39, %v1131_v38  ;;  %v1136_v43 = vrot.slane %v1112_v40, %v1131_v38  ;;  %v1140_v45 = vrot.slane %v1113_v41, %v1131_v38  ;;  %v1144_v50 = vrot.slane %v1114_v46, %v1131_v38 }
0x1650   :  { %v1148_v52 = vrot.slane %v1115_v48, %v1131_v38  ;;  %v1152_v55 = vrot.slane %v1116_v17, %v1131_v38  ;;  %v1156_v59 = vrot.slane %v1117_v53, %v1131_v38 }
0x1651   :  { %v1162_v47 = vsel %vm1161_vm2, %v1136_v43, %v1132_v42 }
0x1652   :  { %v1164_v49 = vsel %vm1163_vm3, %v1140_v45, %v1162_v47 }
0x1653   :  { %v1166_v5 = vsel %vm1165_vm4, %v1144_v50, %v1164_v49 }
0x1654   :  { %v1168_v54 = vsel %vm1167_vm5, %v1148_v52, %v1166_v5 }
0x1655   :  { %v1170_v57 = vsel %vm1169_vm6, %v1152_v55, %v1168_v54 }
0x1656   :  { %v1172_v61 = vsel %vm1171_vm7, %v1156_v59, %v1170_v57 }
0x16a2   :  { %v1100_v56 = vpop.xlane.xlu1 %1099 }
0x16a3   :  { %v1118_v58 = vadd.f32 %v1109_v36, %v1100_v56 }
0x16a5   :  { %v1160_v60 = vrot.slane %v1118_v58, %v1131_v38 }
0x16a6   :  { %v1043_v62 = vpop.permute.xlu1 %1042 }
0x16a7   :  { %v1174_v63 = vsel %vm1173_vm8, %v1160_v60, %v1172_v61  ;;  %1045 = vst.msk [vmem:[%s1809_s10] sm:$0xff] %vm53_vm0, %v1043_v62 }
0x16a8   :  { %1177 = vst.msk [vmem:[%s1810_s8] sm:$0xff] %vm1176_vm9, %v1174_v63 }

</bundles_post_ra>
